<compile_context>
chip_gen: v6e
topology: v6e:2x2x1
jax: 0.10.0
libtpu: 0.0.40
codegen_flags: <defaults>
</compile_context>

<pallas_src>
import jax
import jax.numpy as jnp
from jax.experimental import pallas as pl
from jax.experimental.pallas import tpu as pltpu


# ----------------------------------------------------------------------------
# Kernel: fused (linear stand-in encoder) + pooler tanh + Baseline linear head
# ----------------------------------------------------------------------------
def baseline_kernel(x_ref, wenc_ref, benc_ref, whead_ref, bhead_ref, out_ref):
    """One batch tile of the fused encoder/pooler/head.

    x_ref     : [TB, Dp]  bf16  spatially mean-pooled patch features
    wenc_ref  : [Dp, Hp]  bf16  fused (patch-embed @ pooler-dense) weight
    benc_ref  : [1,  Hp]  f32   fused encoder bias (b_pe @ w_pool + b_pool)
    whead_ref : [Hp, Op]  bf16  Baseline.linear weight (transposed, lane-padded)
    bhead_ref : [1,  Op]  f32   Baseline.linear bias (lane-padded)
    out_ref   : [TB, Op]  f32   Baseline output (lane-padded)
    """
    # fused patch-embed + pooler dense (bf16 MXU, f32 accumulate)
    pre = jnp.dot(x_ref[...], wenc_ref[...],
                  preferred_element_type=jnp.float32) + benc_ref[...]    # [TB, Hp]
    # pooler nonlinearity (f32, EUP) -> pooler_output
    pooler_output = jnp.tanh(pre)
    # Baseline.forward: self.linear(pooler_output)
    out = jnp.dot(pooler_output.astype(jnp.bfloat16), whead_ref[...],
                  preferred_element_type=jnp.float32) + bhead_ref[...]   # [TB, Op]
    out_ref[...] = out.astype(out_ref.dtype)


# ----------------------------------------------------------------------------
# Wrapper helpers
# ----------------------------------------------------------------------------
def _round_up(x, m):
    return ((x + m - 1) // m) * m


def _pad2(a, shape):
    return jnp.pad(a, ((0, shape[0] - a.shape[0]), (0, shape[1] - a.shape[1])))


def pool_image_to_patch_feature(image, patch):
    """[B, C, H, W] -> [B, C*patch*patch]: mean over the patch grid.

    Equals the mean over the patch axis of the ViT patchification
    (image -> [B, Np, C*P*P] -> mean(axis=1)), but XLA fuses this into a single
    pass over the raw image -- no [B, Np, Dp] patch tensor is materialized.
    f32 accumulation preserves precision for large patch counts.
    """
    B, C, H, W = image.shape
    hp, wp = H // patch, W // patch
    x = image.reshape(B, C, hp, patch, wp, patch)
    x = jnp.mean(x, axis=(2, 4), dtype=jnp.float32)       # [B, C, P, P]
    return x.reshape(B, C * patch * patch)                # d = c*P*P + ph*P + pw


def prepare_params(params, dp_pad, hidden_pad, output_pad):
    """Fuse everything linear (pre-tanh) and pad to MXU-friendly shapes.

    tanh((x @ w_pe + b_pe) @ w_pool + b_pool)
      = tanh(x @ (w_pe @ w_pool) + (b_pe @ w_pool + b_pool))   (all linear)
    """
    w_enc = params['w_pe'] @ params['w_pool']                       # [Dp, H] f32
    b_enc = params['b_pe'] @ params['w_pool'] + params['b_pool']    # [1,  H] f32
    return {
        'w_enc': _pad2(w_enc, (dp_pad, hidden_pad)).astype(jnp.bfloat16),
        'b_enc': _pad2(b_enc, (1, hidden_pad)).astype(jnp.float32),
        'w_head': _pad2(params['w_head'],
                        (hidden_pad, output_pad)).astype(jnp.bfloat16),
        'b_head': _pad2(params['b_head'], (1, output_pad)).astype(jnp.float32),
    }


def _choose_batch_tile(batch):
    """Sublane-aligned batch tile; >= 2 grid steps when the batch allows it so
    ("parallel",) can shard the grid across v7x's two TensorCores."""
    b8 = _round_up(max(batch, 1), 8)
    if b8 >= 16:
        return min(256, _round_up((b8 + 1) // 2, 8))
    return b8


# ----------------------------------------------------------------------------
# Forward
# ----------------------------------------------------------------------------
def baseline_forward(image, params, patch):
    B = image.shape[0]
    Dp = params['w_pe'].shape[0]
    H = params['w_pool'].shape[0]
    O = params['w_head'].shape[1]

    Dpad = max(128, _round_up(Dp, 128))     # lane-aligned contraction dim
    Hp = max(128, _round_up(H, 128))        # lane-aligned hidden
    Op = max(128, _round_up(O, 128))        # lane-dense output (unmasked vst)

    # Pooling commutes with the linear patch embedding AND with patchification,
    # so the per-image feature is a single spatial mean of the raw image.
    feat = pool_image_to_patch_feature(image, patch)       # [B, Dp] f32

    tb = _choose_batch_tile(B)
    pB = _round_up(B, tb)
    # Only the tiny [B, Dp] feature array is padded (cheap), never an Np slab.
    feat = jnp.pad(feat, ((0, pB - B), (0, Dpad - Dp))).astype(jnp.bfloat16)

    prep = prepare_params(params, Dpad, Hp, Op)

    out_padded = pl.pallas_call(
        baseline_kernel,
        out_shape=jax.ShapeDtypeStruct((pB, Op), jnp.float32),
        grid=(pB // tb,),
        in_specs=[
            # only streamed input: one batch tile of pooled features per step
            pl.BlockSpec((tb, Dpad), lambda i: (i, 0)),
            # weights/biases stay VMEM-resident across the whole grid
            pl.BlockSpec((Dpad, Hp), lambda i: (0, 0)),
            pl.BlockSpec((1, Hp), lambda i: (0, 0)),
            pl.BlockSpec((Hp, Op), lambda i: (0, 0)),
            pl.BlockSpec((1, Op), lambda i: (0, 0)),
        ],
        out_specs=pl.BlockSpec((tb, Op), lambda i: (i, 0)),
        compiler_params=pltpu.CompilerParams(
            dimension_semantics=("parallel",),      # megacore / v7x dual-TC
            vmem_limit_bytes=32 * 1024 * 1024,      # tiny footprint; safe on v5e/v6e/v7x
        ),
    )(feat, prep['w_enc'], prep['b_enc'], prep['w_head'], prep['b_head'])

    return out_padded[:B, :O]


# ----------------------------------------------------------------------------
# Params + pure-JAX reference (original, un-fused math path)
# ----------------------------------------------------------------------------
def init_params(key, patch_dim, hidden, output):
    ks = jax.random.split(key, 6)
    scale = lambda fan_in: 1.0 / jnp.sqrt(fan_in)
    return {
        'w_pe':   jax.random.uniform(ks[0], (patch_dim, hidden), jnp.float32,
                                     -scale(patch_dim), scale(patch_dim)),
        'b_pe':   jax.random.uniform(ks[1], (1, hidden), jnp.float32,
                                     -scale(patch_dim), scale(patch_dim)),
        'w_pool': jax.random.uniform(ks[2], (hidden, hidden), jnp.float32,
                                     -scale(hidden), scale(hidden)),
        'b_pool': jax.random.uniform(ks[3], (1, hidden), jnp.float32,
                                     -scale(hidden), scale(hidden)),
        'w_head': jax.random.uniform(ks[4], (hidden, output), jnp.float32,
                                     -scale(hidden), scale(hidden)),
        'b_head': jax.random.uniform(ks[5], (1, output), jnp.float32,
                                     -scale(hidden), scale(hidden)),
    }


def extract_patches_nchw(image, patch):
    """[B, C, H, W] -> [B, num_patches, C*patch*patch] (reference path only)."""
    B, C, H, W = image.shape
    hp, wp = H // patch, W // patch
    x = image.reshape(B, C, hp, patch, wp, patch)
    x = jnp.transpose(x, (0, 2, 4, 1, 3, 5))              # [B, hp, wp, C, P, P]
    return x.reshape(B, hp * wp, C * patch * patch)


def reference_forward(image, params, patch):
    """Pure-f32 reference of the ORIGINAL math (token path, no fusion)."""
    patches = extract_patches_nchw(image, patch)
    tokens = jnp.einsum('bnd,dh->bnh', patches, params['w_pe']) + params['b_pe']
    pooled = jnp.mean(tokens, axis=1)
    pooler_output = jnp.tanh(pooled @ params['w_pool'] + params['b_pool'])
    return pooler_output @ params['w_head'] + params['b_head']


if __name__ == "__main__":
    # small shapes consistent with an image encoder + linear head
    B, C, HW, PATCH = 2, 4, 16, 8          # image [2, 4, 16, 16], 4 patches
    HIDDEN, OUTPUT = 32, 8
    PATCH_DIM = C * PATCH * PATCH          # 256

    key = jax.random.PRNGKey(0)
    k_img, k_par = jax.random.split(key)
    image = jax.random.normal(k_img, (B, C, HW, HW), jnp.float32)
    params = init_params(k_par, PATCH_DIM, HIDDEN, OUTPUT)

    out = baseline_forward(image, params, PATCH)
    out = jax.block_until_ready(out)

    ref = reference_forward(image, params, PATCH)
    assert out.shape == (B, OUTPUT)
    # bf16 MXU path vs f32 reference -> relaxed tolerance.
    assert jnp.allclose(out, ref, atol=2e-2, rtol=2e-2), \
        f"max abs err {jnp.max(jnp.abs(out - ref))}"

    # TODO(synk): the real pretrained HF encoder (e.g. ViT/CLIP with attention,
    # LayerNorm, MLP, CLS-token pooler) is external to this module and is
    # replaced by a deterministic linear ViT-style stand-in; the
    # pool-before-matmul / weight-fusion algebra is only valid for this linear
    # stand-in and must not be reused with a nonlinear encoder.
    print("KERNEL_OK")
</pallas_src>

<mosaic_0001>
module attributes {stable_mosaic.version = 11 : i64} {
  func.func @baseline_kernel(%arg0: i32, %arg1: memref<8x256xbf16, #tpu.memory_space<vmem>>, %arg2: memref<256x128xbf16, #tpu.memory_space<vmem>>, %arg3: memref<1x128xf32, #tpu.memory_space<vmem>>, %arg4: memref<128x128xbf16, #tpu.memory_space<vmem>>, %arg5: memref<1x128xf32, #tpu.memory_space<vmem>>, %arg6: memref<8x128xf32, #tpu.memory_space<vmem>>) attributes {dimension_semantics = [#tpu.dimension_semantics<parallel>], iteration_bounds = array<i64: 1>, scalar_prefetch = 0 : i64, scratch_operands = 0 : i64, tpu.core_type = #tpu.core_type<tc>, window_params = [{transform_indices = @transform_0, window_bounds = array<i64: 8, 256>}, {pipeline_mode = #tpu.pipeline_mode<synchronous>, transform_indices = @transform_1, window_bounds = array<i64: 256, 128>}, {pipeline_mode = #tpu.pipeline_mode<synchronous>, transform_indices = @transform_2, window_bounds = array<i64: 1, 128>}, {pipeline_mode = #tpu.pipeline_mode<synchronous>, transform_indices = @transform_3, window_bounds = array<i64: 128, 128>}, {pipeline_mode = #tpu.pipeline_mode<synchronous>, transform_indices = @transform_4, window_bounds = array<i64: 1, 128>}, {transform_indices = @transform_5, window_bounds = array<i64: 8, 128>}]} {
    %c0 = arith.constant 0 : index
    %c0_0 = arith.constant 0 : index
    %0 = vector.load %arg1[%c0, %c0_0] : memref<8x256xbf16, #tpu.memory_space<vmem>>, vector<8x256xbf16>
    %c0_1 = arith.constant 0 : index
    %c0_2 = arith.constant 0 : index
    %1 = vector.load %arg2[%c0_1, %c0_2] : memref<256x128xbf16, #tpu.memory_space<vmem>>, vector<256x128xbf16>
    %cst = arith.constant dense<0.000000e+00> : vector<8x128xf32>
    %2 = tpu.matmul %0, %1, %cst {dimension_numbers = #tpu.dot_dimension_numbers<[1], [0], [0], [1], [0, 0, 1, 1], [], []>} : vector<8x256xbf16>, vector<256x128xbf16>, vector<8x128xf32> -> vector<8x128xf32>
    %c0_3 = arith.constant 0 : index
    %c0_4 = arith.constant 0 : index
    %3 = vector.load %arg3[%c0_3, %c0_4] : memref<1x128xf32, #tpu.memory_space<vmem>>, vector<1x128xf32>
    %4 = vector.broadcast %3 : vector<1x128xf32> to vector<8x128xf32>
    %5 = arith.addf %2, %4 : vector<8x128xf32>
    %6 = math.tanh %5 : vector<8x128xf32>
    %7 = arith.truncf %6 : vector<8x128xf32> to vector<8x128xbf16>
    %c0_5 = arith.constant 0 : index
    %c0_6 = arith.constant 0 : index
    %8 = vector.load %arg4[%c0_5, %c0_6] : memref<128x128xbf16, #tpu.memory_space<vmem>>, vector<128x128xbf16>
    %cst_7 = arith.constant dense<0.000000e+00> : vector<8x128xf32>
    %9 = tpu.matmul %7, %8, %cst_7 {dimension_numbers = #tpu.dot_dimension_numbers<[1], [0], [0], [1], [0, 0, 1, 1], [], []>} : vector<8x128xbf16>, vector<128x128xbf16>, vector<8x128xf32> -> vector<8x128xf32>
    %c0_8 = arith.constant 0 : index
    %c0_9 = arith.constant 0 : index
    %10 = vector.load %arg5[%c0_8, %c0_9] : memref<1x128xf32, #tpu.memory_space<vmem>>, vector<1x128xf32>
    %11 = vector.broadcast %10 : vector<1x128xf32> to vector<8x128xf32>
    %12 = arith.addf %9, %11 : vector<8x128xf32>
    %c0_10 = arith.constant 0 : index
    %c0_11 = arith.constant 0 : index
    %13 = vector.load %arg6[%c0_10, %c0_11] : memref<8x128xf32, #tpu.memory_space<vmem>>, vector<8x128xf32>
    tpu.vector_store %arg6[%c0_10, %c0_11], %12 {strides = array<i32>} : memref<8x128xf32, #tpu.memory_space<vmem>>, vector<8x128xf32>,
    return
  }
  func.func @transform_0(%arg0: i32) -> (i32, i32) {
    %c0_i32 = arith.constant 0 : i32
    %c0_i32_0 = arith.constant 0 : i32
    return %arg0, %c0_i32 : i32, i32
  }
  func.func @transform_1(%arg0: i32) -> (i32, i32) {
    %c0_i32 = arith.constant 0 : i32
    %c0_i32_0 = arith.constant 0 : i32
    %c0_i32_1 = arith.constant 0 : i32
    return %c0_i32, %c0_i32_0 : i32, i32
  }
  func.func @transform_2(%arg0: i32) -> (i32, i32) {
    %c0_i32 = arith.constant 0 : i32
    %c0_i32_0 = arith.constant 0 : i32
    %c0_i32_1 = arith.constant 0 : i32
    return %c0_i32, %c0_i32_0 : i32, i32
  }
  func.func @transform_3(%arg0: i32) -> (i32, i32) {
    %c0_i32 = arith.constant 0 : i32
    %c0_i32_0 = arith.constant 0 : i32
    %c0_i32_1 = arith.constant 0 : i32
    return %c0_i32, %c0_i32_0 : i32, i32
  }
  func.func @transform_4(%arg0: i32) -> (i32, i32) {
    %c0_i32 = arith.constant 0 : i32
    %c0_i32_0 = arith.constant 0 : i32
    %c0_i32_1 = arith.constant 0 : i32
    return %c0_i32, %c0_i32_0 : i32, i32
  }
  func.func @transform_5(%arg0: i32) -> (i32, i32) {
    %c0_i32 = arith.constant 0 : i32
    %c0_i32_0 = arith.constant 0 : i32
    return %arg0, %c0_i32 : i32, i32
  }
}

</mosaic_0001>

<bundles_post_ra>
// kernel: tpu_custom_call.1
= control target key start
LH: loop header
LB: loop body
LE: loop exit
PB: predicated region body
PF: predicated region fallthrough
CT: control target
= control target key end

     0   :  { %10 = vsyncpa [#allocation3], 0  ;;  %s631_s0 = inlined_call_operand.hbm [shape: bf16[8,256], index: 0, kind: input, shape index: {}]   ;;  %s632_s1 = inlined_call_operand.hbm [shape: bf16[256,128], index: 1, kind: input, shape index: {}]   ;;  %s633_s2 = inlined_call_operand.vmem [shape: f32[1,128], index: 2, kind: input, shape index: {}]   ;;  %s634_s3 = inlined_call_operand.hbm [shape: bf16[128,128], index: 3, kind: input, shape index: {}]   ;;  %s635_s4 = inlined_call_operand.vmem [shape: f32[1,128], index: 4, kind: input, shape index: {}]   ;;  %s636_s5 = inlined_call_operand.hbm [shape: f32[8,128], index: 5, kind: output, shape index: {}]  }
   0x1   :  { %11 = vsyncpa [#allocation6], 0 }
   0x2   :  { %12 = vsyncpa [#allocation4], 0  ;;  %s575_s18 = smov [#allocation5]  }
   0x3   :  { %s28_s19 = sshll.u32 %s575_s18, 4  ;;  %s29_s19 = int_to_ptr.vmem [resolvable:$true] %s28_s19 }
   0x4   :  { %s497_s20 = scalar_lea.vmem %s29_s19, 2048  ;;  %p502_p1 = scmp.lt.s32.totalorder %s29_s19, %s29_s19 }
   0x5   :  { %p498_p0 = scmp.ne.s32.totalorder %s29_s19, %s497_s20  ;;  %p503_p2 = scmp.lt.s32.totalorder %s497_s20, %s497_s20 }
   0x7   :  { %p504_p3 = por %p503_p2, %p502_p1 }
   0x9   :  { %p505_p4 = pnand %p504_p3, %p498_p0 }
   0xb   :  { %508 = shalt.err (!%p505_p4)
}
   0xc   :  { %s576_s21 = smov 64   ;;  %s577_s22 = smov 4  }
   0xd   :  { %34 = dma.hbm_to_vmem [thread:$0]  %s632_s1, 2048, %s29_s19, [#allocation6], %s576_s21, %s576_s21, %s577_s22  }
   0xe   :  { %s578_s25 = smov [#allocation2]   ;;  %s579_s27 = smov [#allocation7]  }
   0xf   :  { %s19_s26 = sshll.u32 %s578_s25, 4  ;;  %s42_s28 = sshll.u32 %s579_s27, 4  ;;  %s20_s26 = int_to_ptr.vmem [resolvable:$true] %s19_s26  ;;  %s43_s28 = int_to_ptr.vmem [resolvable:$true] %s42_s28 }
  0x10   :  { %s517_s29 = scalar_lea.vmem %s20_s26, 128  ;;  %p522_p6 = scmp.lt.s32.totalorder %s20_s26, %s20_s26 }
  0x11   :  { %p518_p5 = scmp.ne.s32.totalorder %s20_s26, %s517_s29  ;;  %p523_p7 = scmp.lt.s32.totalorder %s517_s29, %s517_s29 }
  0x13   :  { %p524_p8 = por %p523_p7, %p522_p6 }
  0x15   :  { %p525_p9 = pnand %p524_p8, %p518_p5 }
  0x17   :  { %528 = shalt.err (!%p525_p9)
}
  0x18   :  { %22 = dma.hbm_to_vmem [thread:$0]  %s631_s0, 128, %s20_s26, [#allocation3]  }
  0x19   :  { %s537_s7 = scalar_lea.vmem %s43_s28, 1024  ;;  %p542_p11 = scmp.lt.s32.totalorder %s43_s28, %s43_s28 }
  0x1a   :  { %p538_p10 = scmp.ne.s32.totalorder %s43_s28, %s537_s7  ;;  %p543_p12 = scmp.lt.s32.totalorder %s537_s7, %s537_s7 }
  0x1c   :  { %p544_p13 = por %p543_p12, %p542_p11 }
  0x1e   :  { %p545_p0 = pnand %p544_p13, %p538_p10 }
  0x20   :  { %548 = shalt.err (!%p545_p0)
}
  0x21   :  { %48 = dma.hbm_to_vmem [thread:$0]  %s634_s3, 1024, %s43_s28, [#allocation6], %s576_s21, %s576_s21, %s577_s22  }
  0x22   :  { %569 = dma.done.wait [#allocation3], 128  }
  0x23   :  { %570 = vsyncadd [#allocation3], 4294967168 }
  0x24   :  { %571 = dma.done.wait [#allocation6], 3072  }
  0x25   :  { %572 = vsyncadd [#allocation6], 4294964224  ;;  %v580_v0 = vmov 0.0   ;;  %v461_v1 = vld [vmem:[#allocation5 + $0x78] sm:$0xff]   ;;  %v463_v3 = vld [vmem:[#allocation5 + $0x70] sm:$0xff]   ;;  %vm581_vm0 = vmmov 0  }
  0x26   :  { %433 = vmatprep.subr.bf16.mxu1 %v580_v0  ;;  %v462_v2 = vld [vmem:[#allocation5 + $0x38] sm:$0xff]   ;;  %402 = vmatprep.subr.bf16.mxu0 %v461_v1  ;;  %v464_v4 = vld [vmem:[#allocation5 + $0x30] sm:$0xff]   ;;  %v465_v5 = vld [vmem:[#allocation5 + $0x68] sm:$0xff]   ;;  %s582_s11 = smov [#allocation8]  }
  0x27   :  { %403 = vmatpush3.bf16.msra.mxu0 %v462_v2  ;;  %v466_v6 = vld [vmem:[#allocation5 + $0x28] sm:$0xff]   ;;  %v467_v7 = vld [vmem:[#allocation5 + $0x60] sm:$0xff]   ;;  %v469_v9 = vld [vmem:[#allocation5 + $0x58] sm:$0xff]   ;;  %449 = vmatprep.mubr.msk.bf16.mxu1 %vm581_vm0, %v580_v0  ;;  %s364_s12 = sshll.u32 %s582_s11, 4  ;;  %s365_s12 = int_to_ptr.vmem [resolvable:$true] %s364_s12 }
  0x28   :  { %404 = vmatprep.subr.bf16.mxu0 %v463_v3  ;;  %v468_v8 = vld [vmem:[#allocation5 + $0x20] sm:$0xff]   ;;  %v470_v10 = vld [vmem:[#allocation5 + $0x18] sm:$0xff]   ;;  %v471_v11 = vld [vmem:[#allocation5 + $0x50] sm:$0xff]   ;;  %p554_p2 = scmp.lt.s32.totalorder %s365_s12, %s365_s12 }
  0x29   :  { %v61_v12 = vld [vmem:[#allocation2] sm:$0xff]  ;;  %v472_v13 = vld [vmem:[#allocation5 + $0x10] sm:$0xff]   ;;  %v473_v16 = vld [vmem:[#allocation5 + $0x48] sm:$0xff]  }
  0x2a   :  { %v376_v14 = vcombine.high %v61_v12, %v61_v12  ;;  %v479_v15 = vld [vmem:[#allocation7 + $0x38] sm:$0xff]   ;;  %v480_v17 = vld [vmem:[#allocation7 + $0x30] sm:$0xff]   ;;  %v474_v18 = vld [vmem:[#allocation5 + $0x8] sm:$0xff]   ;;  %v375_v21 = vcombine.low %v61_v12, %v61_v12 }
  0x2b   :  { %405 = vmatpush3.bf16.msra.mxu0 %v464_v4  ;;  %434 = vmatpush3.bf16.msra.mxu1 %v479_v15  ;;  %v475_v19 = vld [vmem:[#allocation5 + $0x40] sm:$0xff]   ;;  %v481_v22 = vld [vmem:[#allocation7 + $0x28] sm:$0xff]   ;;  %v483_v24 = vld [vmem:[#allocation7 + $0x18] sm:$0xff]  }
  0x2c   :  { %406 = vmatprep.subr.bf16.mxu0 %v465_v5  ;;  %236 = vmatprep.mubr.bf16.mxu0 %v376_v14  ;;  %v476_v20 = vld [vmem:[#allocation5] sm:$0xff]   ;;  %v484_v25 = vld [vmem:[#allocation7 + $0x10] sm:$0xff]   ;;  %v485_v26 = vld [vmem:[#allocation7 + $0x8] sm:$0xff]  }
  0x2d   :  { %435 = vmatprep.subr.bf16.mxu1 %v580_v0  ;;  %v482_v23 = vld [vmem:[#allocation7 + $0x20] sm:$0xff]   ;;  %v374_v29 = vld [vmem:[%s633_s2] ss:$0 sm:$0xff]  ;;  %s549_s2 = scalar_lea.vmem %s365_s12, 128 }
  0x2e   :  { %v486_v27 = vld [vmem:[#allocation7] sm:$0xff]   ;;  %v393_v37 = vld [vmem:[%s635_s4] ss:$0 sm:$0xff]  ;;  %p550_p1 = scmp.ne.s32.totalorder %s365_s12, %s549_s2  ;;  %p555_p3 = scmp.lt.s32.totalorder %s549_s2, %s549_s2 }
  0x2f   :  { %407 = vmatpush3.bf16.msra.mxu0 %v466_v6  ;;  %436 = vmatpush3.bf16.msra.mxu1 %v480_v17 }
  0x30   :  { %408 = vmatprep.subr.bf16.mxu0 %v467_v7  ;;  %437 = vmatprep.subr.bf16.mxu1 %v580_v0  ;;  %p556_p4 = por %p555_p3, %p554_p2 }
  0x32   :  { %p557_p5 = pnand %p556_p4, %p550_p1 }
  0x33   :  { %409 = vmatpush3.bf16.msra.mxu0 %v468_v8  ;;  %438 = vmatpush3.bf16.msra.mxu1 %v481_v22 }
  0x34   :  { %410 = vmatprep.subr.bf16.mxu0 %v469_v9  ;;  %439 = vmatprep.subr.bf16.mxu1 %v580_v0 }
  0x37   :  { %411 = vmatpush3.bf16.msra.mxu0 %v470_v10  ;;  %440 = vmatpush3.bf16.msra.mxu1 %v482_v23 }
  0x38   :  { %412 = vmatprep.subr.bf16.mxu0 %v471_v11  ;;  %441 = vmatprep.subr.bf16.mxu1 %v580_v0 }
  0x3b   :  { %413 = vmatpush3.bf16.msra.mxu0 %v472_v13  ;;  %442 = vmatpush3.bf16.msra.mxu1 %v483_v24 }
  0x3c   :  { %414 = vmatprep.subr.bf16.mxu0 %v473_v16  ;;  %443 = vmatprep.subr.bf16.mxu1 %v580_v0 }
  0x3f   :  { %415 = vmatpush3.bf16.msra.mxu0 %v474_v18  ;;  %444 = vmatpush3.bf16.msra.mxu1 %v484_v25 }
  0x40   :  { %416 = vmatprep.subr.bf16.mxu0 %v475_v19  ;;  %445 = vmatprep.subr.bf16.mxu1 %v580_v0 }
  0x43   :  { %417 = vmatpush3.bf16.msra.mxu0 %v476_v20  ;;  %446 = vmatpush3.bf16.msra.mxu1 %v485_v26 }
  0x44   :  { %447 = vmatprep.subr.bf16.mxu1 %v580_v0 }
  0x46   :  { %237 = vmatmul.mubr.bf16.vlgmr.msra.gmra.mxu0 %v375_v21 }
  0x47   :  { %448 = vmatpush3.bf16.msra.mxu1 %v486_v27 }
 0x106   :  { %v418_v28 = vpop.f32.mrf.mxu0 }
 0x108   :  { %v419_v30 = vpop.f32.mrf.mxu0 }
 0x109   :  { %v420_v31 = vadd.f32 %v419_v30, %v418_v28 }
 0x10a   :  { %v421_v32 = vpop.f32.mrf.mxu0 }
 0x10b   :  { %v239_v33 = vadd.f32 %v420_v31, %v374_v29 }
 0x10c   :  { %v422_v34 = vpop.f32.mrf.mxu0 }
 0x10d   :  { %487 = vtanh.f32 %v239_v33 }
 0x11a   :  { %v488_v35 = vpop.eup %487 }
 0x11b   :  { %v245_v36 = vpack.c.bf16 %v488_v35, %v488_v35 }
 0x11d   :  { %450 = vmatmul.mubr.bf16.vlgmr.msra.gmra.mxu1 %v245_v36 }
 0x1dd   :  { %v351_v38 = vpop.f32.mrf.mxu1 }
 0x1de   :  { %v352_v39 = vadd.f32 %v393_v37, %v351_v38 }
 0x1df   :  { %v451_v40 = vpop.f32.mrf.mxu1 }
 0x1e0   :  { %357 = vst [vmem:[#allocation8] sm:$0xff] %v352_v39 }
 0x1e1   :  { %v354_v41 = vpop.f32.mrf.mxu1 }
 0x1e2   :  { %560 = shalt.err (!%p557_p5)
}
 0x1e3   :  { %367 = dma.vmem_to_hbm [thread:$0]  %s365_s12, 128, %s636_s5, [#allocation4]   ;;  %v452_v42 = vpop.f32.mrf.mxu1 }
 0x1e4   :  { %573 = dma.done.wait [#allocation4], 128  }
 0x1e5   :  { %574 = vsyncadd [#allocation4], 4294967168 }
 0x1e6   :  { %371 = vsyncpa [#allocation3], 1 }
 0x1e7   :  { %372 = vsyncpa [#allocation6], 1 }
 0x1e8   :  { %373 = vsyncpa [#allocation4], 1 }

</bundles_post_ra>
